<compile_context>
chip_gen: v7x
topology: tpu7x:2x2x1
jax: 0.10.0
libtpu: 0.0.40
codegen_flags: <defaults>
</compile_context>

<pallas_src>
import functools
import math

import jax
import jax.numpy as jnp
from jax.experimental import pallas as pl
from jax.experimental.pallas import tpu as pltpu


# ----------------------------------------------------------------------------- kernel


def _flash_attn_kernel(q_ref, k_ref, v_ref, o_ref, q_sc, m_sc, l_sc, acc_sc, *,
                       scale, softmax_dtype, out_transposed):
    kv = pl.program_id(2)

    @pl.when(kv == 0)
    def _init():
        # The q block is resident across the whole kv axis: do the scale multiply
        # (and any cast) once per q tile, not once per kv step.
        q_sc[...] = (q_ref[...] * scale).astype(q_sc.dtype)
        # NOTE: -inf init is safe here because no row of scores can be all -inf
        # (no masking).  A masked/causal variant must guard m_new before exp.
        m_sc[...] = jnp.full(m_sc.shape, -jnp.inf, dtype=m_sc.dtype)
        l_sc[...] = jnp.zeros(l_sc.shape, dtype=l_sc.dtype)
        acc_sc[...] = jnp.zeros(acc_sc.shape, dtype=acc_sc.dtype)

    q = q_sc[...]                     # (tb, tq, D), compute dtype, already scaled
    k = k_ref[...]                    # (tb, tk, D)
    v = v_ref[...]                    # (tb, tk, D), or (tb, D, tk) if out_transposed

    if out_transposed:
        # s[b, kk, qq] = sum_d k[b, kk, d] * q[b, qq, d]  ->  (tb, tk, tq) f32.
        # q stays in the lane dim so all softmax stats / acc updates / the final
        # store are lane-dense even for D = 32/64.
        s = jax.lax.dot_general(
            k, q, dimension_numbers=(((2,), (2,)), ((0,), (0,))),
            preferred_element_type=jnp.float32)
        red_axis = 1                  # reduce over keys (sublane axis)
    else:
        s = jax.lax.dot_general(
            q, k, dimension_numbers=(((2,), (2,)), ((0,), (0,))),
            preferred_element_type=jnp.float32)          # (tb, tq, tk) f32
        red_axis = 2                  # reduce over keys (lane axis)

    m_prev = m_sc[...]
    m_new = jnp.maximum(m_prev, jnp.max(s, axis=red_axis, keepdims=True))
    alpha = jnp.exp(m_prev - m_new)   # f32, O(tb*tq)

    x = s - m_new
    if softmax_dtype != jnp.float32:
        # bf16 exp doubles EUP throughput on v6e/v7x; running stats stay f32.
        x = x.astype(softmax_dtype)
    p = jnp.exp(x)

    l_sc[...] = alpha * l_sc[...] + jnp.sum(
        p.astype(jnp.float32), axis=red_axis, keepdims=True)

    p_mm = p.astype(v.dtype)          # probs in operand (bf16) dtype for the MXU
    if out_transposed:
        # acc_t[b, d, qq] += sum_k v_t[b, d, kk] * p[b, kk, qq]  ->  (tb, D, tq)
        pv = jax.lax.dot_general(
            v, p_mm, dimension_numbers=(((2,), (1,)), ((0,), (0,))),
            preferred_element_type=jnp.float32)
    else:
        # acc[b, qq, d] += sum_k p[b, qq, kk] * v[b, kk, d]     ->  (tb, tq, D)
        pv = jax.lax.dot_general(
            p_mm, v, dimension_numbers=(((2,), (1,)), ((0,), (0,))),
            preferred_element_type=jnp.float32)

    acc_sc[...] = alpha * acc_sc[...] + pv
    m_sc[...] = m_new

    @pl.when(kv == pl.num_programs(2) - 1)
    def _finalize():
        # Normalization deferred to the output: O(S*D) per head, not O(S^2).
        inv_l = pl.reciprocal(l_sc[...], approx=False)
        o_ref[...] = (acc_sc[...] * inv_l).astype(o_ref.dtype)


# ----------------------------------------------------------------- planning helpers


def _vmem_capacity_bytes():
    try:
        return int(pltpu.get_tpu_info().vmem_capacity_bytes)
    except Exception:
        return 64 * 1024 * 1024        # conservative: v7x per-TC VMEM


def _has_bf16_vpu():
    # v6e and later have a bf16 VPU/EUP; v5e and older do not.
    try:
        kind = jax.devices()[0].device_kind.lower()
    except Exception:
        return False
    return not any(t in kind for t in ("v2", "v3", "v4", "v5"))


def _largest_divisor_leq(n, cap):
    for d in range(max(1, min(n, cap)), 0, -1):
        if n % d == 0:
            return d
    return 1


def _tile_candidates(S, cap, lane_major):
    """Descending sequence-tile sizes that divide S and satisfy the (8,128) layout
    rule for every BlockSpec the tile appears in (lane dim when lane_major)."""
    cap = max(1, min(S, cap))
    cands = []
    for t in range(cap, 0, -1):
        if S % t:
            continue
        if t == S:
            cands.append(t)            # full extent is always a legal block dim
        elif lane_major:
            if t % 128 == 0:
                cands.append(t)
        elif t % 8 == 0:
            cands.append(t)
    return cands or [S]                # fall back to an untiled sequence axis


# ------------------------------------------------------------------------- wrapper


def attn_pallas(q, k, v, head_dim, *, max_seq_tile=1024, use_bf16_mxu=True,
                softmax_dtype=None, lane_dense_output=None, kv_buffer_count=None,
                vmem_limit_bytes=None):
    """q, k, v: (B, H, S, D). Returns softmax(q k^T / sqrt(head_dim)) v as (B, H, S, D)."""
    B, H, S, D = q.shape
    assert k.shape == (B, H, S, D) and v.shape == (B, H, S, D)
    BH = B * H
    orig_dtype = q.dtype

    # bf16 MXU operands when callers pass f32; accumulation stays f32 on the MXU.
    compute_dtype = (jnp.bfloat16 if (use_bf16_mxu and orig_dtype == jnp.float32)
                     else orig_dtype)
    cd_size = jnp.dtype(compute_dtype).itemsize
    out_size = jnp.dtype(orig_dtype).itemsize

    # Lane-dense (transposed) layout whenever the head dim would otherwise leave
    # 128-wide lanes mostly masked.
    out_transposed = (D < 128) if lane_dense_output is None else bool(lane_dense_output)

    if softmax_dtype is None:
        softmax_dtype = (jnp.bfloat16
                         if (compute_dtype == jnp.bfloat16 and D <= 64 and _has_bf16_vpu())
                         else jnp.float32)
    softmax_dtype = jnp.dtype(softmax_dtype)
    sm_size = softmax_dtype.itemsize

    # --- generation-aware VMEM planning (single source of truth) -----------------
    phys_vmem = _vmem_capacity_bytes()
    if vmem_limit_bytes is None:
        vmem_limit_bytes = min((phys_vmem * 3) // 4, 96 * 1024 * 1024)  # 96M v5e/v6e, 48M v7x
    budget = (int(vmem_limit_bytes) * 4) // 5                           # ~20% headroom

    kv_bufs = 2 if kv_buffer_count is None else max(2, int(kv_buffer_count))

    def per_slice(tq, tk):
        blocks = 2 * tq * D * cd_size                 # q block (double-buffered)
        blocks += 2 * kv_bufs * tk * D * cd_size      # k and v blocks
        blocks += 2 * tq * D * out_size               # output block
        scratch = tq * D * cd_size + tq * D * 4 + 2 * 8 * max(tq, 128) * 4
        inter = tq * tk * (4 + sm_size + cd_size + 8)  # f32 s, p, p-cast, f32 temps
        return blocks + scratch + inter

    # Spend VMEM on tq first (only tq cuts K/V HBM re-reads), then tk, then tb.
    tq_cands = _tile_candidates(S, min(max_seq_tile, 1024), lane_major=out_transposed)
    tk_cands = _tile_candidates(S, min(max_seq_tile, 512), lane_major=out_transposed)
    tq = next((t for t in tq_cands if per_slice(t, tk_cands[-1]) <= budget), tq_cands[-1])
    tk = next((t for t in tk_cands if per_slice(tq, t) <= budget), tk_cands[-1])

    per = per_slice(tq, tk)
    tb = max(1, min(budget // max(per, 1), BH, 256))
    # The (tb, tq, tk) f32 score/prob intermediates round-trip VMEM (not vregs);
    # cap their footprint instead of using a flat tb clamp.
    tb = min(tb, max(1, (4 * 1024 * 1024) // (tq * tk * 4)))
    tb = _largest_divisor_leq(BH, tb)
    num_q = S // tq
    # Megacore: keep >= 2 steps on the parallel axes so a second TC never idles.
    if BH > 1 and (BH // tb) * num_q < 2:
        tb = _largest_divisor_leq(BH, max(1, tb // 2))
    num_kv = S // tk
    grid = (BH // tb, num_q, num_kv)

    # --- operands / specs ---------------------------------------------------------
    qf = q.reshape(BH, S, D).astype(compute_dtype)
    kf = k.reshape(BH, S, D).astype(compute_dtype)
    if out_transposed:
        vf = jnp.swapaxes(v.reshape(BH, S, D), 1, 2).astype(compute_dtype)  # (BH, D, S)
    else:
        vf = v.reshape(BH, S, D).astype(compute_dtype)

    kv_kwargs = {}
    if kv_buffer_count is not None:
        kv_kwargs["pipeline_mode"] = pl.Buffered(int(kv_buffer_count))

    q_spec = pl.BlockSpec((tb, tq, D), lambda b, qi, ki: (b, qi, 0))
    k_spec = pl.BlockSpec((tb, tk, D), lambda b, qi, ki: (b, ki, 0), **kv_kwargs)
    if out_transposed:
        v_spec = pl.BlockSpec((tb, D, tk), lambda b, qi, ki: (b, 0, ki), **kv_kwargs)
        o_spec = pl.BlockSpec((tb, D, tq), lambda b, qi, ki: (b, 0, qi))
        out_shape = jax.ShapeDtypeStruct((BH, D, S), orig_dtype)
        acc_shape, stat_shape = (tb, D, tq), (tb, 1, tq)
    else:
        v_spec = pl.BlockSpec((tb, tk, D), lambda b, qi, ki: (b, ki, 0), **kv_kwargs)
        o_spec = pl.BlockSpec((tb, tq, D), lambda b, qi, ki: (b, qi, 0))
        out_shape = jax.ShapeDtypeStruct((BH, S, D), orig_dtype)
        acc_shape, stat_shape = (tb, tq, D), (tb, tq, 1)

    scale = 1.0 / math.sqrt(head_dim)
    kernel = functools.partial(_flash_attn_kernel, scale=scale,
                               softmax_dtype=softmax_dtype,
                               out_transposed=out_transposed)

    cost = pl.CostEstimate(
        flops=int(4 * BH * S * S * D),                 # QK^T + PV, 2 flops/MAC
        transcendentals=int(BH * S * S),               # exp over the scores
        bytes_accessed=int(BH * S * D * (cd_size * (1 + 2 * num_q) + out_size)),
    )

    out = pl.pallas_call(
        kernel,
        out_shape=out_shape,
        grid_spec=pltpu.PrefetchScalarGridSpec(
            num_scalar_prefetch=0,
            grid=grid,
            in_specs=[q_spec, k_spec, v_spec],
            out_specs=o_spec,
            scratch_shapes=[
                pltpu.VMEM((tb, tq, D), compute_dtype),   # cached scaled q
                pltpu.VMEM(stat_shape, jnp.float32),      # running max
                pltpu.VMEM(stat_shape, jnp.float32),      # running sum
                pltpu.VMEM(acc_shape, jnp.float32),       # f32 output accumulator
            ],
        ),
        compiler_params=pltpu.CompilerParams(
            dimension_semantics=("parallel", "parallel", "arbitrary"),
            vmem_limit_bytes=int(vmem_limit_bytes),
        ),
        cost_estimate=cost,
    )(qf, kf, vf)

    if out_transposed:
        # Layout plumbing only: bring the lane-dense (BH, D, S) result back to the
        # module's (B, H, S, D) layout in the wrapper.
        return jnp.swapaxes(out.reshape(B, H, D, S), -1, -2)
    return out.reshape(B, H, S, D)


def attn_reference(q, k, v, head_dim):
    qf = q.astype(jnp.float32)
    kf = k.astype(jnp.float32)
    vf = v.astype(jnp.float32)
    scores = jnp.einsum("bhqd,bhkd->bhqk", qf, kf) / math.sqrt(head_dim)
    probs = jax.nn.softmax(scores, axis=-1)
    return jnp.einsum("bhqk,bhkd->bhqd", probs, vf)


if __name__ == "__main__":
    key = jax.random.PRNGKey(0)
    kq, kk, kv_ = jax.random.split(key, 3)

    # 1) Module-implied shapes: (batch, heads, seq, head_dim) = (2, 4, 8, 32).
    B, H, S, D = 2, 4, 8, 32
    q = jax.random.normal(kq, (B, H, S, D), dtype=jnp.float32)
    k = jax.random.normal(kk, (B, H, S, D), dtype=jnp.float32)
    v = jax.random.normal(kv_, (B, H, S, D), dtype=jnp.float32)
    ref = attn_reference(q, k, v, D)

    # Exact path (f32 MXU operands, f32 softmax) — tight tolerance.
    out = jax.block_until_ready(attn_pallas(q, k, v, D, use_bf16_mxu=False))
    assert out.shape == (B, H, S, D)
    assert jnp.allclose(out, ref, atol=1e-5, rtol=1e-5), "f32 exact-path mismatch"

    # Default perf path (bf16 MXU operands, f32 accumulation) — looser tolerance.
    out_fast = jax.block_until_ready(attn_pallas(q, k, v, D))
    assert jnp.allclose(out_fast, ref, atol=5e-2, rtol=5e-2), "bf16 MXU-path mismatch"

    # 2) Multi q/kv tile online softmax + lane-dense (transposed) output path.
    B2, H2, S2, D2 = 1, 2, 256, 32
    q2 = jax.random.normal(kq, (B2, H2, S2, D2), dtype=jnp.float32)
    k2 = jax.random.normal(kk, (B2, H2, S2, D2), dtype=jnp.float32)
    v2 = jax.random.normal(kv_, (B2, H2, S2, D2), dtype=jnp.float32)
    ref2 = attn_reference(q2, k2, v2, D2)
    out2 = jax.block_until_ready(
        attn_pallas(q2, k2, v2, D2, max_seq_tile=128, use_bf16_mxu=False))
    assert jnp.allclose(out2, ref2, atol=1e-5, rtol=1e-5), "tiled exact-path mismatch"
    out2b = jax.block_until_ready(attn_pallas(q2, k2, v2, D2, max_seq_tile=128))
    assert jnp.allclose(out2b, ref2, atol=5e-2, rtol=5e-2), "tiled bf16-path mismatch"

    # 3) bf16 inputs stay bf16 on the MXU (f32 accumulation).
    qb, kb, vb = (x.astype(jnp.bfloat16) for x in (q2, k2, v2))
    refb = attn_reference(qb, kb, vb, D2)
    outb = jax.block_until_ready(attn_pallas(qb, kb, vb, D2, max_seq_tile=128))
    assert jnp.allclose(outb.astype(jnp.float32), refb, atol=5e-2, rtol=5e-2), \
        "bf16-input mismatch"

    # 4) D >= 128 keeps the standard (non-transposed) layout.
    B3, H3, S3, D3 = 1, 2, 128, 128
    q3 = jax.random.normal(kq, (B3, H3, S3, D3), dtype=jnp.float32)
    k3 = jax.random.normal(kk, (B3, H3, S3, D3), dtype=jnp.float32)
    v3 = jax.random.normal(kv_, (B3, H3, S3, D3), dtype=jnp.float32)
    ref3 = attn_reference(q3, k3, v3, D3)
    out3 = jax.block_until_ready(attn_pallas(q3, k3, v3, D3, use_bf16_mxu=False))
    assert jnp.allclose(out3, ref3, atol=1e-5, rtol=1e-5), "D=128 path mismatch"

    print("KERNEL_OK")
</pallas_src>

<mosaic_0001>
module attributes {stable_mosaic.version = 11 : i64} {
  func.func @_flash_attn_kernel(%arg0: i32, %arg1: i32, %arg2: i32, %arg3: memref<4x8x32xf32, #tpu.memory_space<vmem>>, %arg4: memref<4x8x32xf32, #tpu.memory_space<vmem>>, %arg5: memref<4x32x8xf32, #tpu.memory_space<vmem>>, %arg6: memref<4x32x8xf32, #tpu.memory_space<vmem>>, %arg7: memref<4x8x32xf32, #tpu.memory_space<vmem>>, %arg8: memref<4x1x8xf32, #tpu.memory_space<vmem>>, %arg9: memref<4x1x8xf32, #tpu.memory_space<vmem>>, %arg10: memref<4x32x8xf32, #tpu.memory_space<vmem>>) attributes {dimension_semantics = [#tpu.dimension_semantics<parallel>, #tpu.dimension_semantics<parallel>, #tpu.dimension_semantics<arbitrary>], iteration_bounds = array<i64: 2, 1, 1>, scalar_prefetch = 0 : i64, scratch_operands = 4 : i64, tpu.core_type = #tpu.core_type<tc>, window_params = [{transform_indices = @transform_0, window_bounds = array<i64: 4, 8, 32>}, {transform_indices = @transform_1, window_bounds = array<i64: 4, 8, 32>}, {transform_indices = @transform_2, window_bounds = array<i64: 4, 32, 8>}, {transform_indices = @transform_3, window_bounds = array<i64: 4, 32, 8>}]} {
    %c0_i32 = arith.constant 0 : i32
    %0 = arith.cmpi eq, %arg2, %c0_i32 : i32
    %1 = arith.extui %0 : i1 to i32
    %c0_i32_0 = arith.constant 0 : i32
    %2 = arith.cmpi ne, %1, %c0_i32_0 : i32
    scf.if %2 {
      %c0_32 = arith.constant 0 : index
      %c0_33 = arith.constant 0 : index
      %c0_34 = arith.constant 0 : index
      %32 = vector.load %arg3[%c0_32, %c0_33, %c0_34] : memref<4x8x32xf32, #tpu.memory_space<vmem>>, vector<4x8x32xf32>
      %cst_35 = arith.constant 0.176776692 : f32
      %33 = vector.broadcast %cst_35 : f32 to vector<4x8x32xf32>
      %34 = arith.mulf %32, %33 : vector<4x8x32xf32>
      %c0_36 = arith.constant 0 : index
      %c0_37 = arith.constant 0 : index
      %c0_38 = arith.constant 0 : index
      %35 = vector.load %arg7[%c0_36, %c0_37, %c0_38] : memref<4x8x32xf32, #tpu.memory_space<vmem>>, vector<4x8x32xf32>
      tpu.vector_store %arg7[%c0_36, %c0_37, %c0_38], %34 {strides = array<i32>} : memref<4x8x32xf32, #tpu.memory_space<vmem>>, vector<4x8x32xf32>,
      %cst_39 = arith.constant 0xFF800000 : f32
      %36 = vector.broadcast %cst_39 : f32 to vector<4x1x8xf32>
      %c0_40 = arith.constant 0 : index
      %c0_41 = arith.constant 0 : index
      %c0_42 = arith.constant 0 : index
      %37 = vector.load %arg8[%c0_40, %c0_41, %c0_42] : memref<4x1x8xf32, #tpu.memory_space<vmem>>, vector<4x1x8xf32>
      tpu.vector_store %arg8[%c0_40, %c0_41, %c0_42], %36 {strides = array<i32>} : memref<4x1x8xf32, #tpu.memory_space<vmem>>, vector<4x1x8xf32>,
      %cst_43 = arith.constant 0.000000e+00 : f32
      %38 = vector.broadcast %cst_43 : f32 to vector<4x1x8xf32>
      %c0_44 = arith.constant 0 : index
      %c0_45 = arith.constant 0 : index
      %c0_46 = arith.constant 0 : index
      %39 = vector.load %arg9[%c0_44, %c0_45, %c0_46] : memref<4x1x8xf32, #tpu.memory_space<vmem>>, vector<4x1x8xf32>
      tpu.vector_store %arg9[%c0_44, %c0_45, %c0_46], %38 {strides = array<i32>} : memref<4x1x8xf32, #tpu.memory_space<vmem>>, vector<4x1x8xf32>,
      %cst_47 = arith.constant 0.000000e+00 : f32
      %40 = vector.broadcast %cst_47 : f32 to vector<4x32x8xf32>
      %c0_48 = arith.constant 0 : index
      %c0_49 = arith.constant 0 : index
      %c0_50 = arith.constant 0 : index
      %41 = vector.load %arg10[%c0_48, %c0_49, %c0_50] : memref<4x32x8xf32, #tpu.memory_space<vmem>>, vector<4x32x8xf32>
      tpu.vector_store %arg10[%c0_48, %c0_49, %c0_50], %40 {strides = array<i32>} : memref<4x32x8xf32, #tpu.memory_space<vmem>>, vector<4x32x8xf32>,
    } else {
    }
    %c0 = arith.constant 0 : index
    %c0_1 = arith.constant 0 : index
    %c0_2 = arith.constant 0 : index
    %3 = vector.load %arg7[%c0, %c0_1, %c0_2] : memref<4x8x32xf32, #tpu.memory_space<vmem>>, vector<4x8x32xf32>
    %c0_3 = arith.constant 0 : index
    %c0_4 = arith.constant 0 : index
    %c0_5 = arith.constant 0 : index
    %4 = vector.load %arg4[%c0_3, %c0_4, %c0_5] : memref<4x8x32xf32, #tpu.memory_space<vmem>>, vector<4x8x32xf32>
    %c0_6 = arith.constant 0 : index
    %c0_7 = arith.constant 0 : index
    %c0_8 = arith.constant 0 : index
    %5 = vector.load %arg5[%c0_6, %c0_7, %c0_8] : memref<4x32x8xf32, #tpu.memory_space<vmem>>, vector<4x32x8xf32>
    %cst = arith.constant dense<0.000000e+00> : vector<4x8x8xf32>
    %6 = tpu.matmul %4, %3, %cst {dimension_numbers = #tpu.dot_dimension_numbers<[2], [2], [1], [1], [0, 0, 0, 1, 1, 1], [0], [0]>} : vector<4x8x32xf32>, vector<4x8x32xf32>, vector<4x8x8xf32> -> vector<4x8x8xf32>
    %c0_9 = arith.constant 0 : index
    %c0_10 = arith.constant 0 : index
    %c0_11 = arith.constant 0 : index
    %7 = vector.load %arg8[%c0_9, %c0_10, %c0_11] : memref<4x1x8xf32, #tpu.memory_space<vmem>>, vector<4x1x8xf32>
    %cst_12 = arith.constant dense<0xFF800000> : vector<4x8xf32>
    %8 = vector.multi_reduction <maximumf>, %6, %cst_12 [1] : vector<4x8x8xf32> to vector<4x8xf32>
    %9 = vector.shape_cast %8 : vector<4x8xf32> to vector<4x1x8xf32>
    %10 = arith.maximumf %7, %9 : vector<4x1x8xf32>
    %11 = arith.subf %7, %10 : vector<4x1x8xf32>
    %12 = math.exp %11 : vector<4x1x8xf32>
    %13 = vector.broadcast %10 : vector<4x1x8xf32> to vector<4x8x8xf32>
    %14 = arith.subf %6, %13 : vector<4x8x8xf32>
    %15 = math.exp %14 : vector<4x8x8xf32>
    %c0_13 = arith.constant 0 : index
    %c0_14 = arith.constant 0 : index
    %c0_15 = arith.constant 0 : index
    %16 = vector.load %arg9[%c0_13, %c0_14, %c0_15] : memref<4x1x8xf32, #tpu.memory_space<vmem>>, vector<4x1x8xf32>
    %17 = arith.mulf %12, %16 : vector<4x1x8xf32>
    %cst_16 = arith.constant dense<0.000000e+00> : vector<4x8xf32>
    %18 = vector.multi_reduction <add>, %15, %cst_16 [1] : vector<4x8x8xf32> to vector<4x8xf32>
    %19 = vector.shape_cast %18 : vector<4x8xf32> to vector<4x1x8xf32>
    %20 = arith.addf %17, %19 : vector<4x1x8xf32>
    %c0_17 = arith.constant 0 : index
    %c0_18 = arith.constant 0 : index
    %c0_19 = arith.constant 0 : index
    %21 = vector.load %arg9[%c0_17, %c0_18, %c0_19] : memref<4x1x8xf32, #tpu.memory_space<vmem>>, vector<4x1x8xf32>
    tpu.vector_store %arg9[%c0_17, %c0_18, %c0_19], %20 {strides = array<i32>} : memref<4x1x8xf32, #tpu.memory_space<vmem>>, vector<4x1x8xf32>,
    %cst_20 = arith.constant dense<0.000000e+00> : vector<4x32x8xf32>
    %22 = tpu.matmul %5, %15, %cst_20 {dimension_numbers = #tpu.dot_dimension_numbers<[2], [1], [1], [2], [0, 0, 0, 1, 1, 2], [0], [0]>} : vector<4x32x8xf32>, vector<4x8x8xf32>, vector<4x32x8xf32> -> vector<4x32x8xf32>
    %c0_21 = arith.constant 0 : index
    %c0_22 = arith.constant 0 : index
    %c0_23 = arith.constant 0 : index
    %23 = vector.load %arg10[%c0_21, %c0_22, %c0_23] : memref<4x32x8xf32, #tpu.memory_space<vmem>>, vector<4x32x8xf32>
    %24 = vector.broadcast %12 : vector<4x1x8xf32> to vector<4x32x8xf32>
    %25 = arith.mulf %24, %23 : vector<4x32x8xf32>
    %26 = arith.addf %25, %22 : vector<4x32x8xf32>
    %c0_24 = arith.constant 0 : index
    %c0_25 = arith.constant 0 : index
    %c0_26 = arith.constant 0 : index
    %27 = vector.load %arg10[%c0_24, %c0_25, %c0_26] : memref<4x32x8xf32, #tpu.memory_space<vmem>>, vector<4x32x8xf32>
    tpu.vector_store %arg10[%c0_24, %c0_25, %c0_26], %26 {strides = array<i32>} : memref<4x32x8xf32, #tpu.memory_space<vmem>>, vector<4x32x8xf32>,
    %c0_27 = arith.constant 0 : index
    %c0_28 = arith.constant 0 : index
    %c0_29 = arith.constant 0 : index
    %28 = vector.load %arg8[%c0_27, %c0_28, %c0_29] : memref<4x1x8xf32, #tpu.memory_space<vmem>>, vector<4x1x8xf32>
    tpu.vector_store %arg8[%c0_27, %c0_28, %c0_29], %10 {strides = array<i32>} : memref<4x1x8xf32, #tpu.memory_space<vmem>>, vector<4x1x8xf32>,
    %c0_i32_30 = arith.constant 0 : i32
    %29 = arith.cmpi eq, %arg2, %c0_i32_30 : i32
    %30 = arith.extui %29 : i1 to i32
    %c0_i32_31 = arith.constant 0 : i32
    %31 = arith.cmpi ne, %30, %c0_i32_31 : i32
    scf.if %31 {
      %c0_32 = arith.constant 0 : index
      %c0_33 = arith.constant 0 : index
      %c0_34 = arith.constant 0 : index
      %32 = vector.load %arg9[%c0_32, %c0_33, %c0_34] : memref<4x1x8xf32, #tpu.memory_space<vmem>>, vector<4x1x8xf32>
      %33 = tpu.reciprocal %32 : vector<4x1x8xf32> -> vector<4x1x8xf32>
      %c0_35 = arith.constant 0 : index
      %c0_36 = arith.constant 0 : index
      %c0_37 = arith.constant 0 : index
      %34 = vector.load %arg10[%c0_35, %c0_36, %c0_37] : memref<4x32x8xf32, #tpu.memory_space<vmem>>, vector<4x32x8xf32>
      %35 = vector.broadcast %33 : vector<4x1x8xf32> to vector<4x32x8xf32>
      %36 = arith.mulf %34, %35 : vector<4x32x8xf32>
      %c0_38 = arith.constant 0 : index
      %c0_39 = arith.constant 0 : index
      %c0_40 = arith.constant 0 : index
      %37 = vector.load %arg6[%c0_38, %c0_39, %c0_40] : memref<4x32x8xf32, #tpu.memory_space<vmem>>, vector<4x32x8xf32>
      tpu.vector_store %arg6[%c0_38, %c0_39, %c0_40], %36 {strides = array<i32>} : memref<4x32x8xf32, #tpu.memory_space<vmem>>, vector<4x32x8xf32>,
    } else {
    }
    return
  }
  func.func @transform_0(%arg0: i32, %arg1: i32, %arg2: i32) -> (i32, i32, i32) {
    %c0_i32 = arith.constant 0 : i32
    %c0_i32_0 = arith.constant 0 : i32
    return %arg0, %arg1, %c0_i32 : i32, i32, i32
  }
  func.func @transform_1(%arg0: i32, %arg1: i32, %arg2: i32) -> (i32, i32, i32) {
    %c0_i32 = arith.constant 0 : i32
    %c0_i32_0 = arith.constant 0 : i32
    return %arg0, %arg2, %c0_i32 : i32, i32, i32
  }
  func.func @transform_2(%arg0: i32, %arg1: i32, %arg2: i32) -> (i32, i32, i32) {
    %c0_i32 = arith.constant 0 : i32
    %c0_i32_0 = arith.constant 0 : i32
    return %arg0, %c0_i32, %arg2 : i32, i32, i32
  }
  func.func @transform_3(%arg0: i32, %arg1: i32, %arg2: i32) -> (i32, i32, i32) {
    %c0_i32 = arith.constant 0 : i32
    %c0_i32_0 = arith.constant 0 : i32
    return %arg0, %c0_i32, %arg1 : i32, i32, i32
  }
}

</mosaic_0001>

<bundles_post_ra>
// kernel: tpu_custom_call.1
= control target key start
LH: loop header
LB: loop body
LE: loop exit
PB: predicated region body
PF: predicated region fallthrough
CT: control target
= control target key end

     0   :  { %s1689_s12 = smov 0   ;;  %s1691_s13 = smov 0   ;;  %s1967_s0 = inlined_call_operand.vmem [shape: f32[8,8,32], index: 0, kind: input, shape index: {}]   ;;  %s1968_s1 = inlined_call_operand.vmem [shape: f32[8,8,32], index: 1, kind: input, shape index: {}]   ;;  %s1969_s2 = inlined_call_operand.vmem [shape: f32[8,32,8], index: 2, kind: input, shape index: {}]   ;;  %s1970_s3 = inlined_call_operand.vmem [shape: f32[8,32,8], index: 3, kind: output, shape index: {}]  }
   0x1   :  { %s1693_s14 = smov 0  }
   0x2 LB: > { %s32_s15 = sadd.s32 1, %s1660_s13  ;;  %p1472_p0 = scmp.ge.s32.totalorder %s1664_s14, 1  ;;  %s1664_s14 = sphi %s1693_s14, %s13_s14   ;;  %s1660_s13 = sphi %s1691_s13, %s1973_s13   ;;  %s1656_s12 = sphi %s1689_s12, %s1972_s12  }
   0x3   : > { %p34_p1 = scmp.ge.s32.totalorder %s32_s15, 2  ;;  %p197_p2 = scmp.lt.s32.totalorder %s1664_s14, 3 }
   0x5   : > { %s1975_s15 = smov (%p34_p1, %s32_s15), 0  ;;  %p198_p3 = pnand %p1472_p0, %p197_p2 }
   0x6   : > { %s1473_s16 = sshll.u32 (!%p198_p3), %s1656_s12, 2  ;;  %vm300_vm0 = vcmask (!%p198_p3), 57344   ;;  %v1666_v0 = vmov (!%p198_p3), 0.0   ;;  %vm309_vm1 = vcmask (!%p198_p3), 64512   ;;  %vm1667_vm2 = vmmov (!%p198_p3), 0  }
   0x7   : > { %201 = sbr.rel (%p198_p3) target bundleno = 516 (0x204), region = 32  ;;  %1539 = vmatprep.subr.mxu0 (!%p198_p3), %v1666_v0  ;;  %1544 = vmatprep.subr.mxu1 (!%p198_p3), %v1666_v0  ;;  %p1714_p4 = scmp.lt.s32.totalorder (!%p198_p3), %s1473_s16, 7  ;;  %305 = vst.msk [vmem:[#allocation4] sm:$0x1] (!%p198_p3), %vm300_vm0, %v1666_v0  ;;  %306 = vst.msk [vmem:[#allocation4 + $0x1] sm:$0x1] (!%p198_p3), %vm300_vm0, %v1666_v0  ;;  %v708_v28 = vlaneseq (!%p198_p3) }
   0x8   : > { %307 = vst.msk [vmem:[#allocation4 + $0x2] sm:$0x1] (!%p198_p3), %vm300_vm0, %v1666_v0  ;;  %308 = vst.msk [vmem:[#allocation4 + $0x3] sm:$0x1] (!%p198_p3), %vm300_vm0, %v1666_v0  ;;  %1541 = vmatprep.mubr.msk.f32.mxu0 (!%p198_p3), %vm1667_vm2, %v1666_v0  ;;  %1546 = vmatprep.mubr.msk.f32.mxu1 (!%p198_p3), %vm1667_vm2, %v1666_v0  ;;  %v1668_v1 = vmov (!%p198_p3), -inf   ;;  %vm295_vm3 = vcmask (!%p198_p3), 261120  }
   0x9   : > { %301 = vst.msk [vmem:[#allocation3] sm:$0x1] (!%p198_p3), %vm300_vm0, %v1668_v1  ;;  %302 = vst.msk [vmem:[#allocation3 + $0x1] sm:$0x1] (!%p198_p3), %vm300_vm0, %v1668_v1  ;;  %v709_v41 = vshrl.u32 (!%p198_p3), %v708_v28, 7 }
   0xa   : > { %303 = vst.msk [vmem:[#allocation3 + $0x2] sm:$0x1] (!%p198_p3), %vm300_vm0, %v1668_v1  ;;  %304 = vst.msk [vmem:[#allocation3 + $0x3] sm:$0x1] (!%p198_p3), %vm300_vm0, %v1668_v1 }
   0xb   : > { %310 = vst.msk [vmem:[#allocation5] sm:$0xff] (!%p198_p3), %vm309_vm1, %v1666_v0  ;;  %311 = vst.msk [vmem:[#allocation5 + $0x8] sm:$0xff] (!%p198_p3), %vm309_vm1, %v1666_v0  ;;  %v1813_v51 = vsub.s32 (!%p198_p3), 0, %v709_v41 }
   0xc   : > { %312 = vst.msk [vmem:[#allocation5 + $0x10] sm:$0xff] (!%p198_p3), %vm309_vm1, %v1666_v0  ;;  %313 = vst.msk [vmem:[#allocation5 + $0x18] sm:$0xff] (!%p198_p3), %vm309_vm1, %v1666_v0 }
   0xd   : > { %314 = vst.msk [vmem:[#allocation5 + $0x20] sm:$0xff] (!%p198_p3), %vm309_vm1, %v1666_v0  ;;  %315 = vst.msk [vmem:[#allocation5 + $0x28] sm:$0xff] (!%p198_p3), %vm309_vm1, %v1666_v0 }
   0xe   : > { %316 = vst.msk [vmem:[#allocation5 + $0x30] sm:$0xff] %vm309_vm1, %v1666_v0  ;;  %317 = vst.msk [vmem:[#allocation5 + $0x38] sm:$0xff] %vm309_vm1, %v1666_v0  ;;  %s1977_s16 = smov (!%p1714_p4, %s1473_s16), 7 }
   0xf   : > { %318 = vst.msk [vmem:[#allocation5 + $0x40] sm:$0xff] %vm309_vm1, %v1666_v0  ;;  %319 = vst.msk [vmem:[#allocation5 + $0x48] sm:$0xff] %vm309_vm1, %v1666_v0  ;;  %s1474_s18 = sshll.u32 %s1977_s16, 3  ;;  %s1509_s25 = sshll.u32 %s1977_s16, 5 }
  0x10   : > { %320 = vst.msk [vmem:[#allocation5 + $0x50] sm:$0xff] %vm309_vm1, %v1666_v0  ;;  %321 = vst.msk [vmem:[#allocation5 + $0x58] sm:$0xff] %vm309_vm1, %v1666_v0  ;;  %s252_s21 = scalar_lea.vmem %s1967_s0, %s1474_s18  ;;  %s261_s24 = scalar_lea.vmem %s1968_s1, %s1474_s18  ;;  %v655_v50 = vld [vmem:[#allocation3] sm:$0x1]  ;;  %v656_v52 = vld [vmem:[#allocation3 + $0x1] sm:$0x1] }
  0x11   : > { %322 = vst.msk [vmem:[#allocation5 + $0x60] sm:$0xff] %vm309_vm1, %v1666_v0  ;;  %323 = vst.msk [vmem:[#allocation5 + $0x68] sm:$0xff] %vm309_vm1, %v1666_v0  ;;  %v287_v2 = vld [vmem:[%s252_s21] sm:$0xff]  ;;  %v288_v3 = vld [vmem:[%s252_s21 + $0x8] sm:$0xff]  ;;  %s1803_s28 = scalar_lea.vmem %s1969_s2, %s1509_s25  ;;  %s1907_s4 = scalar_lea.vmem %s1970_s3, %s1509_s25 }
  0x12   : > { %324 = vst.msk [vmem:[#allocation5 + $0x70] sm:$0xff] %vm309_vm1, %v1666_v0  ;;  %325 = vst.msk [vmem:[#allocation5 + $0x78] sm:$0xff] %vm309_vm1, %v1666_v0  ;;  %v289_v4 = vld [vmem:[%s252_s21 + $0x10] sm:$0xff]  ;;  %v291_v5 = vmul.f32 0.17677669, %v287_v2  ;;  %v290_v8 = vld [vmem:[%s252_s21 + $0x18] sm:$0xff] }
  0x13   : > { %v292_v6 = vmul.f32 0.17677669, %v288_v3  ;;  %v293_v7 = vmul.f32 0.17677669, %v289_v4  ;;  %v294_v9 = vmul.f32 0.17677669, %v290_v8 }
  0x14   : > { %296 = vst.msk [vmem:[#allocation2] sm:$0xff] %vm295_vm3, %v291_v5  ;;  %v330_v12 = vld [vmem:[%s261_s24] sm:$0xff]  ;;  %v331_v13 = vld [vmem:[%s261_s24 + $0x8] sm:$0xff]  ;;  %v332_v16 = vld [vmem:[%s261_s24 + $0x10] sm:$0xff] }
  0x15   : > { %297 = vst.msk [vmem:[#allocation2 + $0x8] sm:$0xff] %vm295_vm3, %v292_v6  ;;  %298 = vst.msk [vmem:[#allocation2 + $0x10] sm:$0xff] %vm295_vm3, %v293_v7  ;;  %v333_v17 = vld [vmem:[%s261_s24 + $0x18] sm:$0xff]  ;;  %v334_v18 = vld [vmem:[%s1803_s28] sm:$0xff] }
  0x16   : > { %299 = vst.msk [vmem:[#allocation2 + $0x18] sm:$0xff] %vm295_vm3, %v294_v9  ;;  %v338_v19 = vld [vmem:[%s1803_s28 + $0x20] sm:$0xff] }
  0x17   : > { %v657_v1 = vld [vmem:[#allocation3 + $0x2] sm:$0x1]  ;;  %v658_v2 = vld [vmem:[#allocation3 + $0x3] sm:$0x1] }
  0x1b   : > { %v326_v10 = vld [vmem:[#allocation2] sm:$0xff] }
  0x1c   : > { %v327_v11 = vld [vmem:[#allocation2 + $0x8] sm:$0xff]  ;;  %1540 = vmatpush3.xpose.msk.msra.mxu0 %vm295_vm3, %v326_v10  ;;  %v328_v14 = vld [vmem:[#allocation2 + $0x10] sm:$0xff] }
  0x1d   : > { %1545 = vmatpush3.xpose.msk.msra.mxu1 %vm295_vm3, %v327_v11  ;;  %1549 = vmatprep.subr.mxu0 %v1666_v0  ;;  %v329_v15 = vld [vmem:[#allocation2 + $0x18] sm:$0xff] }
  0x1e   : > { %1554 = vmatprep.subr.mxu1 %v1666_v0 }
  0x1f   : > { %1542 = vmatmul.mubr.msk.f32.vlgmr.msra.gmra.mrb[0].mxu0 %vm295_vm3, %v330_v12 }
  0x20   : > { %1547 = vmatmul.mubr.msk.f32.vlgmr.msra.gmra.mrb[0].mxu1 %vm295_vm3, %v331_v13  ;;  %1550 = vmatpush3.xpose.msk.msra.mxu0 %vm295_vm3, %v328_v14 }
  0x21   : > { %1555 = vmatpush3.xpose.msk.msra.mxu1 %vm295_vm3, %v329_v15  ;;  %1551 = vmatprep.mubr.msk.f32.mxu0 %vm1667_vm2, %v1666_v0 }
  0x22   : > { %1556 = vmatprep.mubr.msk.f32.mxu1 %vm1667_vm2, %v1666_v0 }
  0x23   : > { %1552 = vmatmul.mubr.msk.f32.vlgmr.msra.gmra.mrb[2].mxu0 %vm295_vm3, %v332_v16 }
  0x24   : > { %1557 = vmatmul.mubr.msk.f32.vlgmr.msra.gmra.mrb[2].mxu1 %vm295_vm3, %v333_v17  ;;  %1561 = vmatprep.mubr.msk.f32.mxu0 %vm309_vm1, %v334_v18 }
  0x25   : > { %1569 = vmatprep.mubr.msk.f32.mxu1 %vm309_vm1, %v338_v19 }
  0xf2   : > { %v423_v20 = vpop.f32.mrb[0].mxu0 }
  0xf3   : > { %v499_v21 = vpop.f32.mrb[0].mxu1  ;;  %v660_v22 = vsel %vm309_vm1, %v423_v20, -inf  ;;  %v1543_v24 = vpop.f32.mrb[1].mxu0 }
  0xf4   : > { %v667_v23 = vsel %vm309_vm1, %v499_v21, -inf  ;;  %v1548_v25 = vpop.f32.mrb[1].mxu1  ;;  %v661_v26 = vrot.slane %v660_v22, 4 }
  0xf5   : > { %v668_v27 = vrot.slane %v667_v23, 4 }
  0xf6   : > { %v662_v29 = vmax.f32 %v660_v22, %v661_v26  ;;  %v575_v31 = vpop.f32.mrb[2].mxu0 }
  0xf7   : > { %v669_v30 = vmax.f32 %v667_v23, %v668_v27  ;;  %v651_v32 = vpop.f32.mrb[2].mxu1  ;;  %v674_v33 = vsel %vm309_vm1, %v575_v31, -inf  ;;  %v1553_v35 = vpop.f32.mrb[3].mxu0  ;;  %v335_v27 = vld [vmem:[%s1803_s28 + $0x8] sm:$0xff] }
  0xf8   : > { %v681_v34 = vsel %vm309_vm1, %v651_v32, -inf  ;;  %v1558_v36 = vpop.f32.mrb[3].mxu1  ;;  %v663_v37 = vrot.slane %v662_v29, 2  ;;  %v675_v39 = vrot.slane %v674_v33, 4  ;;  %v340_v35 = vld [vmem:[%s1803_s28 + $0x30] sm:$0xff] }
  0xf9   : > { %v670_v38 = vrot.slane %v669_v30, 2  ;;  %v682_v40 = vrot.slane %v681_v34, 4 }
  0xfa   : > { %v664_v42 = vmax.f32 %v662_v29, %v663_v37  ;;  %v676_v44 = vmax.f32 %v674_v33, %v675_v39 }
  0xfb   : > { %v671_v43 = vmax.f32 %v669_v30, %v670_v38  ;;  %v683_v45 = vmax.f32 %v681_v34, %v682_v40 }
  0xfc   : > { %v665_v46 = vrot.slane %v664_v42, 1  ;;  %v677_v48 = vrot.slane %v676_v44, 2 }
  0xfd   : > { %v672_v47 = vrot.slane %v671_v43, 1  ;;  %v684_v49 = vrot.slane %v683_v45, 2 }
  0xfe   : > { %v666_v53 = vmax.f32 %v664_v42, %v665_v46  ;;  %v678_v55 = vmax.f32 %v676_v44, %v677_v48  ;;  %v341_v48 = vld [vmem:[%s1803_s28 + $0x38] sm:$0xff] }
  0xff   : > { %v673_v54 = vmax.f32 %v671_v43, %v672_v47  ;;  %v685_v56 = vmax.f32 %v683_v45, %v684_v49  ;;  %v337_v43 = vld [vmem:[%s1803_s28 + $0x18] sm:$0xff]  ;;  %v342_v49 = vld [vmem:[%s1803_s28 + $0x40] sm:$0xff] }
 0x100   : > { %v688_v57 = vmax.f32 %v655_v50, %v666_v53  ;;  %v679_v59 = vrot.slane %v678_v55, 1 }
 0x101   : > { %v689_v58 = vmax.f32 %v656_v52, %v673_v54  ;;  %v686_v60 = vrot.slane %v685_v56, 1  ;;  %v346_v54 = vld [vmem:[%s1803_s28 + $0x60] sm:$0xff] }
 0x102   : > { %v692_v61 = vsub.f32 %v655_v50, %v688_v57  ;;  %v711_v62 = vrot.slane %v688_v57, %v1813_v51  ;;  %1261 = vst.msk [vmem:[#allocation3] sm:$0x1] %vm300_vm0, %v688_v57  ;;  %v680_v3 = vmax.f32 %v678_v55, %v679_v59  ;;  %v740_v57 = vld [vmem:[#allocation4] sm:$0x1] }
 0x103   : > { %v693_v63 = vsub.f32 %v656_v52, %v689_v58  ;;  %v715_v0 = vrot.slane %v689_v58, %v1813_v51  ;;  %1262 = vst.msk [vmem:[#allocation3 + $0x1] sm:$0x1] %vm300_vm0, %v689_v58  ;;  %v687_v4 = vmax.f32 %v685_v56, %v686_v60  ;;  %v343_v60 = vld [vmem:[%s1803_s28 + $0x48] sm:$0xff] }
 0x104   : > { %v696_v5 = vmul.f32 1.442695, %v692_v61  ;;  %v728_v6 = vsub.f32 %v423_v20, %v711_v62  ;;  %v690_v9 = vmax.f32 %v657_v1, %v680_v3  ;;  %v741_v62 = vld [vmem:[#allocation4 + $0x1] sm:$0x1] }
 0x105   : > { %v698_v7 = vmul.f32 1.442695, %v693_v63  ;;  %v729_v8 = vsub.f32 %v499_v21, %v715_v0  ;;  %v691_v10 = vmax.f32 %v658_v2, %v687_v4  ;;  %v347_v0 = vld [vmem:[%s1803_s28 + $0x68] sm:$0xff]  ;;  %v348_v4 = vld [vmem:[%s1803_s28 + $0x70] sm:$0xff] }
 0x106   : > { %1618 = vpow2.f32 %v696_v5  ;;  %v732_v11 = vmul.f32 1.442695, %v728_v6  ;;  %v694_v13 = vsub.f32 %v657_v1, %v690_v9  ;;  %v719_v14 = vrot.slane %v690_v9, %v1813_v51  ;;  %1263 = vst.msk [vmem:[#allocation3 + $0x2] sm:$0x1] %vm300_vm0, %v690_v9  ;;  %v344_v1 = vld [vmem:[%s1803_s28 + $0x50] sm:$0xff] }
 0x107   : > { %v734_v12 = vmul.f32 1.442695, %v729_v8  ;;  %1620 = vpow2.f32 %v698_v7  ;;  %v695_v15 = vsub.f32 %v658_v2, %v691_v10  ;;  %1264 = vst.msk [vmem:[#allocation3 + $0x3] sm:$0x1] %vm300_vm0, %v691_v10  ;;  %v723_v16 = vrot.slane %v691_v10, %v1813_v51 }
 0x108   : > { %1622 = vpow2.f32 %v732_v11  ;;  %v700_v17 = vmul.f32 1.442695, %v694_v13  ;;  %v730_v18 = vsub.f32 %v575_v31, %v719_v14  ;;  %v339_v31 = vld [vmem:[%s1803_s28 + $0x28] sm:$0xff]  ;;  %v345_v11 = vld [vmem:[%s1803_s28 + $0x58] sm:$0xff]  ;;  %v742_v13 = vld [vmem:[#allocation4 + $0x2] sm:$0x1] }
 0x109   : > { %1624 = vpow2.f32 %v734_v12  ;;  %v702_v19 = vmul.f32 1.442695, %v695_v15  ;;  %v731_v20 = vsub.f32 %v651_v32, %v723_v16  ;;  %v336_v32 = vld [vmem:[%s1803_s28 + $0x10] sm:$0xff]  ;;  %v349_v15 = vld [vmem:[%s1803_s28 + $0x78] sm:$0xff] }
 0x10a   : > { %1626 = vpow2.f32 %v700_v17  ;;  %v736_v21 = vmul.f32 1.442695, %v730_v18  ;;  %v743_v18 = vld [vmem:[#allocation4 + $0x3] sm:$0x1] }
 0x10b   : > { %1628 = vpow2.f32 %v702_v19  ;;  %v738_v22 = vmul.f32 1.442695, %v731_v20 }
 0x10c   : > { %1630 = vpow2.f32 %v736_v21 }
 0x10d   : > { %1632 = vpow2.f32 %v738_v22 }
 0x110   : > { %v1619_v23 = vpop.eup %1618 }
 0x111   : > { %v1823_v24 = vpop.eup %1620  ;;  %v1826_v25 = vrot.slane %v1619_v23, %v1813_v51  ;;  %v744_v5 = vmul.f32 %v1619_v23, %v740_v57 }
 0x112   : > { %v1623_v26 = vpop.eup %1622  ;;  %v1831_v28 = vrot.slane %v1823_v24, %v1813_v51  ;;  %v745_v8 = vmul.f32 %v1823_v24, %v741_v62 }
 0x113   : > { %v1625_v29 = vpop.eup %1624  ;;  %v748_v30 = vsel %vm309_vm1, %v1623_v26, 0.0  ;;  %1559 = vmatprep.subr.mxu0 %v1623_v26 }
 0x114   : > { %v749_v33 = vrot.slane %v748_v30, 4  ;;  %v755_v34 = vsel %vm309_vm1, %v1625_v29, 0.0  ;;  %1567 = vmatprep.subr.mxu1 %v1625_v29  ;;  %1560 = vmatpush3.msra.mxu0 %v1623_v26  ;;  %v1838_v36 = vpop.eup %1626 }
 0x115   : > { %v756_v37 = vrot.slane %v755_v34, 4  ;;  %1568 = vmatpush3.msra.mxu1 %v1625_v29  ;;  %1562 = vmatmul.mubr.msk.f32.vlgmr.msra.gmra.mrb[4].mxu0 %vm309_vm1, %v335_v27  ;;  %v1841_v38 = vpop.eup %1628  ;;  %v1847_v40 = vrot.slane %v1838_v36, %v1813_v51  ;;  %v746_v20 = vmul.f32 %v1838_v36, %v742_v13 }
 0x116   : > { %v750_v39 = vadd.f32 %v749_v33, %v748_v30  ;;  %1570 = vmatmul.mubr.msk.f32.vlgmr.msra.gmra.mrb[4].mxu1 %vm309_vm1, %v339_v31  ;;  %1564 = vmatprep.mubr.msk.f32.mxu0 %vm309_vm1, %v336_v32  ;;  %v1631_v41 = vpop.eup %1630  ;;  %v1853_v44 = vrot.slane %v1841_v38, %v1813_v51  ;;  %v747_v22 = vmul.f32 %v1841_v38, %v743_v18  ;;  %v1174_v30 = vld [vmem:[#allocation5 + $0x8] sm:$0xff]  ;;  %v1173_v32 = vld [vmem:[#allocation5] sm:$0xff] }
 0x117   : > { %v757_v42 = vadd.f32 %v756_v37, %v755_v34  ;;  %1572 = vmatprep.mubr.msk.f32.mxu1 %vm309_vm1, %v340_v35  ;;  %v1633_v45 = vpop.eup %1632  ;;  %v762_v47 = vsel %vm309_vm1, %v1631_v41, 0.0  ;;  %1575 = vmatprep.subr.mxu0 %v1631_v41  ;;  %v1178_v31 = vld [vmem:[#allocation5 + $0x28] sm:$0xff]  ;;  %v1177_v33 = vld [vmem:[#allocation5 + $0x20] sm:$0xff]  ;;  %v1214_v34 = vmul.f32 %v1826_v25, %v1174_v30  ;;  %v1213_v37 = vmul.f32 %v1826_v25, %v1173_v32 }
 0x118   : > { %v751_v46 = vrot.slane %v750_v39, 2  ;;  %v763_v52 = vrot.slane %v762_v47, 4  ;;  %v769_v53 = vsel %vm309_vm1, %v1633_v45, 0.0  ;;  %1583 = vmatprep.subr.mxu1 %v1633_v45  ;;  %1576 = vmatpush3.msra.mxu0 %v1631_v41  ;;  %v1218_v36 = vmul.f32 %v1831_v28, %v1178_v31 }
 0x119   : > { %v758_v50 = vrot.slane %v757_v42, 2  ;;  %v770_v56 = vrot.slane %v769_v53, 4  ;;  %1584 = vmatpush3.msra.mxu1 %v1633_v45  ;;  %1565 = vmatmul.mubr.msk.f32.gmra.mrb[6].mxu0 %vm309_vm1, %v337_v43  ;;  %v1176_v43 = vld [vmem:[#allocation5 + $0x18] sm:$0xff] }
 0x11a   : > { %v752_v55 = vadd.f32 %v751_v46, %v750_v39  ;;  %v764_v59 = vadd.f32 %v763_v52, %v762_v47  ;;  %1573 = vmatmul.mubr.msk.f32.gmra.mrb[6].mxu1 %vm309_vm1, %v341_v48  ;;  %1577 = vmatprep.mubr.msk.f32.mxu0 %vm309_vm1, %v342_v49  ;;  %v1180_v48 = vld [vmem:[#allocation5 + $0x38] sm:$0xff]  ;;  %v1175_v49 = vld [vmem:[#allocation5 + $0x10] sm:$0xff] }
 0x11b   : > { %v759_v58 = vadd.f32 %v758_v50, %v757_v42  ;;  %v771_v63 = vadd.f32 %v770_v56, %v769_v53  ;;  %1585 = vmatprep.mubr.msk.f32.mxu1 %vm309_vm1, %v346_v54  ;;  %v1217_v42 = vmul.f32 %v1831_v28, %v1177_v33  ;;  %v1179_v53 = vld [vmem:[#allocation5 + $0x30] sm:$0xff]  ;;  %v1220_v57 = vmul.f32 %v1831_v28, %v1180_v48 }
 0x11c   : > { %v753_v61 = vrot.slane %v752_v55, 1  ;;  %v765_v3 = vrot.slane %v764_v59, 2 }
 0x11d   : > { %v760_v2 = vrot.slane %v759_v58, 1  ;;  %v772_v7 = vrot.slane %v771_v63, 2  ;;  %1578 = vmatmul.mubr.msk.f32.vlgmr.msra.gmra.mrb[8].mxu0 %vm309_vm1, %v343_v60 }
 0x11e   : > { %v754_v6 = vadd.f32 %v753_v61, %v752_v55  ;;  %v766_v10 = vadd.f32 %v765_v3, %v764_v59  ;;  %1586 = vmatmul.mubr.msk.f32.vlgmr.msra.gmra.mrb[8].mxu1 %vm309_vm1, %v347_v0  ;;  %1580 = vmatprep.mubr.msk.f32.mxu0 %vm309_vm1, %v344_v1  ;;  %v1216_v55 = vmul.f32 %v1826_v25, %v1176_v43  ;;  %v1182_v59 = vld [vmem:[#allocation5 + $0x48] sm:$0xff] }
 0x11f   : > { %v761_v9 = vadd.f32 %v760_v2, %v759_v58  ;;  %v773_v14 = vadd.f32 %v772_v7, %v771_v63  ;;  %1588 = vmatprep.mubr.msk.f32.mxu1 %vm309_vm1, %v348_v4  ;;  %v1215_v58 = vmul.f32 %v1826_v25, %v1175_v49  ;;  %v1219_v0 = vmul.f32 %v1831_v28, %v1179_v53  ;;  %v1186_v1 = vld [vmem:[#allocation5 + $0x68] sm:$0xff]  ;;  %v1181_v2 = vld [vmem:[#allocation5 + $0x40] sm:$0xff] }
 0x120   : > { %v776_v12 = vadd.f32 %v754_v6, %v744_v5  ;;  %v767_v17 = vrot.slane %v766_v10, 1  ;;  %v1185_v7 = vld [vmem:[#allocation5 + $0x60] sm:$0xff] }
 0x121   : > { %v777_v16 = vadd.f32 %v761_v9, %v745_v8  ;;  %v774_v19 = vrot.slane %v773_v14, 1  ;;  %1581 = vmatmul.mubr.msk.f32.gmra.mrb[10].mxu0 %vm309_vm1, %v345_v11  ;;  %v1222_v8 = vmul.f32 %v1847_v40, %v1182_v59  ;;  %v1221_v11 = vmul.f32 %v1847_v40, %v1181_v2 }
 0x122   : > { %781 = vst.msk [vmem:[#allocation4] sm:$0x1] %vm300_vm0, %v776_v12  ;;  %v768_v21 = vadd.f32 %v767_v17, %v766_v10  ;;  %1589 = vmatmul.mubr.msk.f32.gmra.mrb[10].mxu1 %vm309_vm1, %v349_v15  ;;  %v1226_v10 = vmul.f32 %v1853_v44, %v1186_v1  ;;  %v1184_v12 = vld [vmem:[#allocation5 + $0x58] sm:$0xff]  ;;  %v1225_v18 = vmul.f32 %v1853_v44, %v1185_v7 }
 0x123   : > { %782 = vst.msk [vmem:[#allocation4 + $0x1] sm:$0x1] %vm300_vm0, %v777_v16  ;;  %v775_v23 = vadd.f32 %v774_v19, %v773_v14  ;;  %v1188_v19 = vld [vmem:[#allocation5 + $0x78] sm:$0xff] }
 0x124   : > { %v778_v24 = vadd.f32 %v768_v21, %v746_v20  ;;  %v1183_v20 = vld [vmem:[#allocation5 + $0x50] sm:$0xff] }
 0x125   : > { %v779_v26 = vadd.f32 %v775_v23, %v747_v22 }
 0x126   : > { %783 = vst.msk [vmem:[#allocation4 + $0x2] sm:$0x1] %vm300_vm0, %v778_v24 }
 0x127   : > { %784 = vst.msk [vmem:[#allocation4 + $0x3] sm:$0x1] %vm300_vm0, %v779_v26 }
 0x129   : > { %v1268_v27 = vld [vmem:[#allocation4] sm:$0x1] }
 0x12a   : > { %v1269_v29 = vld [vmem:[#allocation4 + $0x1] sm:$0x1]  ;;  %1634 = vrcp.f32 %v1268_v27 }
 0x12b   : > { %1636 = vrcp.f32 %v1269_v29  ;;  %v1187_v29 = vld [vmem:[#allocation5 + $0x70] sm:$0xff] }
 0x12c   : > { %v1227_v43 = vmul.f32 %v1853_v44, %v1187_v29 }
 0x12d   : > { %v1270_v50 = vld [vmem:[#allocation4 + $0x2] sm:$0x1] }
 0x12e   : > { %v1271_v54 = vld [vmem:[#allocation4 + $0x3] sm:$0x1]  ;;  %1638 = vrcp.f32 %v1270_v50 }
 0x12f   : > { %1640 = vrcp.f32 %v1271_v54 }
 0x134   : > { %v1635_v60 = vpop.eup %1634 }
 0x135   : > { %v1637_v3 = vpop.eup %1636  ;;  %v1299_v9 = vrot.slane %v1635_v60, %v1813_v51 }
 0x136   : > { %v1303_v14 = vrot.slane %v1637_v3, %v1813_v51 }
 0x1e8   : > { %v1563_v35 = vpop.f32.mrb[4].mxu0 }
 0x1e9   : > { %v1230_v38 = vadd.f32 %v1563_v35, %v1214_v34  ;;  %v1571_v39 = vpop.f32.mrb[4].mxu1  ;;  %v863_v41 = vpop.f32.mrb[5].mxu0  ;;  %v1224_v34 = vmul.f32 %v1847_v40, %v1184_v12 }
 0x1ea   : > { %v1234_v45 = vadd.f32 %v1571_v39, %v1218_v36  ;;  %v1229_v46 = vadd.f32 %v1213_v37, %v863_v41  ;;  %v960_v47 = vpop.f32.mrb[5].mxu1  ;;  %v1228_v37 = vmul.f32 %v1853_v44, %v1188_v19 }
 0x1eb   : > { %1246 = vst.msk [vmem:[#allocation5 + $0x8] sm:$0xff] %vm309_vm1, %v1230_v38  ;;  %v1233_v52 = vadd.f32 %v1217_v42, %v960_v47  ;;  %v1223_v38 = vmul.f32 %v1847_v40, %v1183_v20 }
 0x1ec   : > { %1250 = vst.msk [vmem:[#allocation5 + $0x28] sm:$0xff] %vm309_vm1, %v1234_v45  ;;  %1245 = vst.msk [vmem:[#allocation5] sm:$0xff] %vm309_vm1, %v1229_v46  ;;  %v1566_v56 = vpop.f32.mrb[6].mxu0  ;;  %v1639_v45 = vpop.eup %1638 }
 0x1ed   : > { %1249 = vst.msk [vmem:[#allocation5 + $0x20] sm:$0xff] %vm309_vm1, %v1233_v52  ;;  %v1232_v61 = vadd.f32 %v1566_v56, %v1216_v55  ;;  %v1574_v62 = vpop.f32.mrb[6].mxu1  ;;  %v873_v63 = vpop.f32.mrb[7].mxu0 }
 0x1ee   : > { %v1236_v4 = vadd.f32 %v1574_v62, %v1220_v57  ;;  %v1231_v5 = vadd.f32 %v1215_v58, %v873_v63  ;;  %v970_v6 = vpop.f32.mrb[7].mxu1  ;;  %v1641_v40 = vpop.eup %1640  ;;  %v1307_v58 = vrot.slane %v1639_v45, %v1813_v51 }
 0x1ef   : > { %1248 = vst.msk [vmem:[#allocation5 + $0x18] sm:$0xff] %vm309_vm1, %v1232_v61  ;;  %v1235_v25 = vadd.f32 %v1219_v0, %v970_v6  ;;  %v1311_v60 = vrot.slane %v1641_v40, %v1813_v51 }
 0x1f0   : > { %1252 = vst.msk [vmem:[#allocation5 + $0x38] sm:$0xff] %vm309_vm1, %v1236_v4  ;;  %1247 = vst.msk [vmem:[#allocation5 + $0x10] sm:$0xff] %vm309_vm1, %v1231_v5  ;;  %v1579_v28 = vpop.f32.mrb[8].mxu0 }
 0x1f1   : > { %1251 = vst.msk [vmem:[#allocation5 + $0x30] sm:$0xff] %vm309_vm1, %v1235_v25  ;;  %v1238_v15 = vadd.f32 %v1579_v28, %v1222_v8  ;;  %v1587_v16 = vpop.f32.mrb[8].mxu1  ;;  %v1057_v17 = vpop.f32.mrb[9].mxu0 }
 0x1f2   : > { %v1277_v13 = vld [vmem:[#allocation5 + $0x8] sm:$0xff]  ;;  %v1242_v24 = vadd.f32 %v1587_v16, %v1226_v10  ;;  %v1237_v26 = vadd.f32 %v1221_v11, %v1057_v17  ;;  %v1154_v27 = vpop.f32.mrb[9].mxu1 }
 0x1f3   : > { %v1317_v21 = vmul.f32 %v1299_v9, %v1277_v13  ;;  %v1281_v22 = vld [vmem:[#allocation5 + $0x28] sm:$0xff]  ;;  %v1276_v23 = vld [vmem:[#allocation5] sm:$0xff]  ;;  %1254 = vst.msk [vmem:[#allocation5 + $0x48] sm:$0xff] %vm309_vm1, %v1238_v15  ;;  %v1241_v33 = vadd.f32 %v1225_v18, %v1154_v27 }
 0x1f4   : > { %v1321_v30 = vmul.f32 %v1303_v14, %v1281_v22  ;;  %v1316_v31 = vmul.f32 %v1299_v9, %v1276_v23  ;;  %v1280_v32 = vld [vmem:[#allocation5 + $0x20] sm:$0xff]  ;;  %1258 = vst.msk [vmem:[#allocation5 + $0x68] sm:$0xff] %vm309_vm1, %v1242_v24  ;;  %1253 = vst.msk [vmem:[#allocation5 + $0x40] sm:$0xff] %vm309_vm1, %v1237_v26  ;;  %v1582_v36 = vpop.f32.mrb[10].mxu0 }
 0x1f5   : > { %1333 = vst.msk [vmem:[%s1907_s4 + $0x8] sm:$0xff] %vm309_vm1, %v1317_v21  ;;  %v1320_v35 = vmul.f32 %v1303_v14, %v1280_v32  ;;  %1257 = vst.msk [vmem:[#allocation5 + $0x60] sm:$0xff] %vm309_vm1, %v1241_v33  ;;  %v1240_v39 = vadd.f32 %v1582_v36, %v1224_v34  ;;  %v1590_v41 = vpop.f32.mrb[10].mxu1  ;;  %v1067_v42 = vpop.f32.mrb[11].mxu0 }
 0x1f6   : > { %1337 = vst.msk [vmem:[%s1907_s4 + $0x28] sm:$0xff] %vm309_vm1, %v1321_v30  ;;  %1332 = vst.msk [vmem:[%s1907_s4] sm:$0xff] %vm309_vm1, %v1316_v31  ;;  %v1279_v46 = vld [vmem:[#allocation5 + $0x18] sm:$0xff]  ;;  %v1244_v47 = vadd.f32 %v1590_v41, %v1228_v37  ;;  %v1239_v48 = vadd.f32 %v1223_v38, %v1067_v42  ;;  %v1164_v49 = vpop.f32.mrb[11].mxu1 }
 0x1f7   : > { %1336 = vst.msk [vmem:[%s1907_s4 + $0x20] sm:$0xff] %vm309_vm1, %v1320_v35  ;;  %v1319_v50 = vmul.f32 %v1299_v9, %v1279_v46  ;;  %v1283_v52 = vld [vmem:[#allocation5 + $0x38] sm:$0xff]  ;;  %v1278_v53 = vld [vmem:[#allocation5 + $0x10] sm:$0xff]  ;;  %1256 = vst.msk [vmem:[#allocation5 + $0x58] sm:$0xff] %vm309_vm1, %v1240_v39  ;;  %v1243_v54 = vadd.f32 %v1227_v43, %v1164_v49 }
 0x1f8   : > { %v1323_v55 = vmul.f32 %v1303_v14, %v1283_v52  ;;  %v1318_v44 = vmul.f32 %v1299_v9, %v1278_v53  ;;  %v1282_v56 = vld [vmem:[#allocation5 + $0x30] sm:$0xff]  ;;  %1260 = vst.msk [vmem:[#allocation5 + $0x78] sm:$0xff] %vm309_vm1, %v1244_v47  ;;  %1255 = vst.msk [vmem:[#allocation5 + $0x50] sm:$0xff] %vm309_vm1, %v1239_v48 }
 0x1f9   : > { %1335 = vst.msk [vmem:[%s1907_s4 + $0x18] sm:$0xff] %vm309_vm1, %v1319_v50  ;;  %v1322_v57 = vmul.f32 %v1303_v14, %v1282_v56  ;;  %1259 = vst.msk [vmem:[#allocation5 + $0x70] sm:$0xff] %vm309_vm1, %v1243_v54 }
 0x1fa   : > { %1339 = vst.msk [vmem:[%s1907_s4 + $0x38] sm:$0xff] %vm309_vm1, %v1323_v55  ;;  %1334 = vst.msk [vmem:[%s1907_s4 + $0x10] sm:$0xff] %vm309_vm1, %v1318_v44  ;;  %v1285_v59 = vld [vmem:[#allocation5 + $0x48] sm:$0xff] }
 0x1fb   : > { %1338 = vst.msk [vmem:[%s1907_s4 + $0x30] sm:$0xff] %vm309_vm1, %v1322_v57  ;;  %v1325_v61 = vmul.f32 %v1307_v58, %v1285_v59  ;;  %v1289_v62 = vld [vmem:[#allocation5 + $0x68] sm:$0xff]  ;;  %v1284_v63 = vld [vmem:[#allocation5 + $0x40] sm:$0xff] }
 0x1fc   : > { %v1329_v0 = vmul.f32 %v1311_v60, %v1289_v62  ;;  %v1324_v1 = vmul.f32 %v1307_v58, %v1284_v63  ;;  %v1288_v2 = vld [vmem:[#allocation5 + $0x60] sm:$0xff] }
 0x1fd   : > { %1341 = vst.msk [vmem:[%s1907_s4 + $0x48] sm:$0xff] %vm309_vm1, %v1325_v61  ;;  %v1328_v3 = vmul.f32 %v1311_v60, %v1288_v2 }
 0x1fe   : > { %1345 = vst.msk [vmem:[%s1907_s4 + $0x68] sm:$0xff] %vm309_vm1, %v1329_v0  ;;  %1340 = vst.msk [vmem:[%s1907_s4 + $0x40] sm:$0xff] %vm309_vm1, %v1324_v1  ;;  %v1287_v51 = vld [vmem:[#allocation5 + $0x58] sm:$0xff] }
 0x1ff   : > { %1344 = vst.msk [vmem:[%s1907_s4 + $0x60] sm:$0xff] %vm309_vm1, %v1328_v3  ;;  %v1327_v4 = vmul.f32 %v1307_v58, %v1287_v51  ;;  %v1291_v5 = vld [vmem:[#allocation5 + $0x78] sm:$0xff]  ;;  %v1286_v6 = vld [vmem:[#allocation5 + $0x50] sm:$0xff] }
 0x200   : > { %v1331_v7 = vmul.f32 %v1311_v60, %v1291_v5  ;;  %v1326_v25 = vmul.f32 %v1307_v58, %v1286_v6  ;;  %v1290_v8 = vld [vmem:[#allocation5 + $0x70] sm:$0xff] }
 0x201   : > { %1343 = vst.msk [vmem:[%s1907_s4 + $0x58] sm:$0xff] %vm309_vm1, %v1327_v4  ;;  %v1330_v9 = vmul.f32 %v1311_v60, %v1290_v8 }
 0x202   : > { %1347 = vst.msk [vmem:[%s1907_s4 + $0x78] sm:$0xff] %vm309_vm1, %v1331_v7  ;;  %1342 = vst.msk [vmem:[%s1907_s4 + $0x50] sm:$0xff] %vm309_vm1, %v1326_v25 }
 0x203   : > { %1346 = vst.msk [vmem:[%s1907_s4 + $0x70] sm:$0xff] %vm309_vm1, %v1330_v9 }
 0x204 PF: > { %s13_s14 = sadd.s32 1, %s1664_s14   ;;  %s1972_s12 = smov %s1660_s13 }
 0x205   : > { %p10_p5 = scmp.ge.s32.totalorder %s13_s14, 4   ;;  %s1973_s13 = smov %s1975_s15 }
 0x207   :  { %12 = sbr.rel (!%p10_p5) target bundleno = 2 (0x2), region = 76 }

</bundles_post_ra>
